<compile_context>
chip_gen: v7x
topology: tpu7x:2x2x1
jax: 0.10.0
libtpu: 0.0.40
codegen_flags: <defaults>
</compile_context>

<pallas_src>
import jax
import jax.numpy as jnp
from jax.experimental import pallas as pl
from jax.experimental.pallas import tpu as pltpu


# ----------------------------------------------------------------------------
# Kernel bodies (one tile of TB batch rows per grid step)
# ----------------------------------------------------------------------------
def _attend(h, ctx, keep, wc_ref, attn_ref):
    """h: (TB, D), ctx: (TB, L, D) in the input dtype; keep: (TB, L) int8 or None."""
    # scores[b, l] = <ctx[b, l, :], h[b, :]> : VPU multiply, f32 lane-reduce.
    scores = jnp.sum(ctx * h[:, None, :], axis=-1, dtype=jnp.float32)   # (TB, L)

    if keep is not None:
        scores = jnp.where(keep.astype(jnp.int32) == 0, -jnp.inf, scores)

    # Softmax over the sequence axis (torch nn.Softmax(dim=1)).
    m = jnp.max(scores, axis=-1, keepdims=True)
    p = jnp.exp(scores - m)
    denom = jnp.sum(p, axis=-1, keepdims=True)
    attn = p / denom                                  # exact divide (matches torch)

    # weighted_context[b, d] = sum_l attn[b, l] * ctx[b, l, d]
    wc = jnp.sum(attn.astype(ctx.dtype)[:, :, None] * ctx, axis=1,
                 dtype=jnp.float32)                                      # (TB, D)

    wc_ref[...] = wc.astype(wc_ref.dtype)
    attn_ref[...] = attn.astype(attn_ref.dtype)


def _soft_attention_kernel_nomask(h_ref, ctx_ref, wc_ref, attn_ref):
    _attend(h_ref[...], ctx_ref[...], None, wc_ref, attn_ref)


def _soft_attention_kernel_masked(h_ref, ctx_ref, mask_ref, wc_ref, attn_ref):
    _attend(h_ref[...], ctx_ref[...], mask_ref[...], wc_ref, attn_ref)


# ----------------------------------------------------------------------------
# Batch-tile selection (VMEM-aware, megacore-aware)
# ----------------------------------------------------------------------------
def _round_up(x, m):
    return ((x + m - 1) // m) * m


def _choose_batch_tile(B, L, D, itemsize, *, block_b, vmem_budget_bytes):
    """Largest batch tile whose (double-buffered, layout-padded) blocks fit the
    VMEM budget, small enough to bound in-kernel temporaries, and leaving >= 2
    grid steps when the batch allows it (v7x has two TensorCores)."""
    d_pad = _round_up(D, 128)          # lane padding
    l_pad = _round_up(L, 128)
    l_sub = _round_up(L, 8)            # sublane padding
    bytes_per_row = 2 * (              # x2: Pallas double-buffers every block
        l_sub * d_pad * itemsize       #   context (in)
        + d_pad * itemsize             #   h (in)
        + l_pad * 1                    #   int8 mask (in)
        + d_pad * itemsize             #   weighted_context (out)
        + l_pad * 4                    #   attn (out, f32)
    )
    tb = max(1, vmem_budget_bytes // bytes_per_row)
    # Keep one context tile <= ~2 MiB: the HBM DMA per step is already large,
    # and bigger tiles only grow the broadcast temporaries (spill pressure).
    tb = min(tb, max(8, (2 * 1024 * 1024) // max(L * D * itemsize, 1)))
    tb = min(tb, block_b, B)
    if B >= 16:                        # >= 2 grid steps for 2-TC chips (v7x)
        tb = min(tb, _round_up(pl.cdiv(B, 2), 8))
    if tb >= B:
        return B                       # single full-batch block is always legal
    if tb >= 8:
        tb = (tb // 8) * 8             # sublane-aligned second-to-last block dim
    return max(tb, 1)


# ----------------------------------------------------------------------------
# Wrapper
# ----------------------------------------------------------------------------
def soft_attention(h, context, mask=None, *, block_b=64):
    """h: (B, D); context: (B, L, D); mask: (B, L), 0 = masked out (or None).

    Returns (weighted_context (B, D), attn (B, L)) like SoftAttention.forward.
    """
    B, L, D = context.shape
    assert h.shape == (B, D), (h.shape, context.shape)

    itemsize = jnp.dtype(context.dtype).itemsize
    vmem_budget = 16 * 1024 * 1024        # safe scoped budget on v5e / v6e / v7x
    tb = _choose_batch_tile(B, L, D, itemsize, block_b=block_b,
                            vmem_budget_bytes=vmem_budget)
    grid = (pl.cdiv(B, tb),)              # ragged last block handled by Pallas

    out_shape = (
        jax.ShapeDtypeStruct((B, D), context.dtype),   # weighted_context
        jax.ShapeDtypeStruct((B, L), jnp.float32),     # attn
    )
    out_specs = (
        pl.BlockSpec((tb, D), lambda i: (i, 0)),
        pl.BlockSpec((tb, L), lambda i: (i, 0)),
    )
    h_spec = pl.BlockSpec((tb, D), lambda i: (i, 0))
    ctx_spec = pl.BlockSpec((tb, L, D), lambda i: (i, 0, 0))
    compiler_params = pltpu.CompilerParams(
        dimension_semantics=("parallel",),             # shard batch tiles on v7x
        vmem_limit_bytes=32 * 1024 * 1024,
    )

    if mask is None:
        # Dedicated kernel: no mask DMA, no compare/select.
        wc, attn = pl.pallas_call(
            _soft_attention_kernel_nomask,
            out_shape=out_shape,
            grid=grid,
            in_specs=[h_spec, ctx_spec],
            out_specs=out_specs,
            compiler_params=compiler_params,
        )(h, context)
    else:
        mask_i8 = (jnp.asarray(mask) != 0).astype(jnp.int8)   # 4x less mask DMA
        wc, attn = pl.pallas_call(
            _soft_attention_kernel_masked,
            out_shape=out_shape,
            grid=grid,
            in_specs=[h_spec, ctx_spec,
                      pl.BlockSpec((tb, L), lambda i: (i, 0))],
            out_specs=out_specs,
            compiler_params=compiler_params,
        )(h, context, mask_i8)

    return wc, attn


# ----------------------------------------------------------------------------
# Pure-JAX reference (mirrors the PyTorch forward; HIGHEST = true f32 on TPU)
# ----------------------------------------------------------------------------
def ref_soft_attention(h, context, mask=None):
    hp = jax.lax.Precision.HIGHEST
    scores = jnp.einsum("bld,bd->bl", context, h, precision=hp)
    if mask is not None:
        scores = jnp.where(mask == 0, -jnp.inf, scores)
    attn = jax.nn.softmax(scores, axis=-1)
    wc = jnp.einsum("bl,bld->bd", attn, context, precision=hp)
    return wc, attn


# ----------------------------------------------------------------------------
# Deterministic tests
# ----------------------------------------------------------------------------
if __name__ == "__main__":
    key = jax.random.PRNGKey(0)
    k_h, k_c, k_h2, k_c2 = jax.random.split(key, 4)

    # --- masked case: B=16 -> TB=8 -> grid=(2,) --------------------------------
    B, L, D = 16, 16, 32
    h = jax.random.normal(k_h, (B, D), jnp.float32)
    context = jax.random.normal(k_c, (B, L, D), jnp.float32)
    mask = jnp.ones((B, L), jnp.float32)
    mask = (mask.at[0, 0].set(0.0).at[1, L - 1].set(0.0)
                 .at[3, 4].set(0.0).at[7, 2:5].set(0.0))   # never a full row -> no NaN

    wc, attn = soft_attention(h, context, mask)
    jax.block_until_ready((wc, attn))
    wc_ref, attn_ref = ref_soft_attention(h, context, mask)
    assert wc.shape == (B, D) and attn.shape == (B, L)
    assert jnp.allclose(attn, attn_ref, atol=1e-3, rtol=1e-3)
    assert jnp.allclose(wc, wc_ref, atol=1e-3, rtol=1e-3)

    # --- mask=None path (dedicated kernel, no mask traffic) --------------------
    wc2, attn2 = soft_attention(h, context, None)
    jax.block_until_ready((wc2, attn2))
    wc2_ref, attn2_ref = ref_soft_attention(h, context, None)
    assert jnp.allclose(attn2, attn2_ref, atol=1e-3, rtol=1e-3)
    assert jnp.allclose(wc2, wc2_ref, atol=1e-3, rtol=1e-3)

    # --- ragged batch (B % TB != 0): no wrapper padding needed -----------------
    B3 = 20   # TB=16 -> grid=(2,), last block has 4 valid rows
    h3 = jax.random.normal(k_h2, (B3, D), jnp.float32)
    context3 = jax.random.normal(k_c2, (B3, L, D), jnp.float32)
    wc3, attn3 = soft_attention(h3, context3, None)
    jax.block_until_ready((wc3, attn3))
    wc3_ref, attn3_ref = ref_soft_attention(h3, context3, None)
    assert wc3.shape == (B3, D) and attn3.shape == (B3, L)
    assert jnp.allclose(attn3, attn3_ref, atol=1e-3, rtol=1e-3)
    assert jnp.allclose(wc3, wc3_ref, atol=1e-3, rtol=1e-3)

    print("KERNEL_OK")
</pallas_src>

<mosaic_0001>
module attributes {stable_mosaic.version = 11 : i64} {
  func.func @_soft_attention_kernel_masked(%arg0: i32, %arg1: memref<8x32xf32, #tpu.memory_space<vmem>>, %arg2: memref<8x16x32xf32, #tpu.memory_space<vmem>>, %arg3: memref<8x16xi8, #tpu.memory_space<vmem>>, %arg4: memref<8x32xf32, #tpu.memory_space<vmem>>, %arg5: memref<8x16xf32, #tpu.memory_space<vmem>>) attributes {dimension_semantics = [#tpu.dimension_semantics<parallel>], iteration_bounds = array<i64: 2>, scalar_prefetch = 0 : i64, scratch_operands = 0 : i64, tpu.core_type = #tpu.core_type<tc>, window_params = [{transform_indices = @transform_0, window_bounds = array<i64: 8, 32>}, {transform_indices = @transform_1, window_bounds = array<i64: 8, 16, 32>}, {transform_indices = @transform_2, window_bounds = array<i64: 8, 16>}, {transform_indices = @transform_3, window_bounds = array<i64: 8, 32>}, {transform_indices = @transform_4, window_bounds = array<i64: 8, 16>}]} {
    %c0 = arith.constant 0 : index
    %c0_0 = arith.constant 0 : index
    %0 = vector.load %arg1[%c0, %c0_0] : memref<8x32xf32, #tpu.memory_space<vmem>>, vector<8x32xf32>
    %c0_1 = arith.constant 0 : index
    %c0_2 = arith.constant 0 : index
    %c0_3 = arith.constant 0 : index
    %1 = vector.load %arg2[%c0_1, %c0_2, %c0_3] : memref<8x16x32xf32, #tpu.memory_space<vmem>>, vector<8x16x32xf32>
    %c0_4 = arith.constant 0 : index
    %c0_5 = arith.constant 0 : index
    %2 = vector.load %arg3[%c0_4, %c0_5] : memref<8x16xi8, #tpu.memory_space<vmem>>, vector<8x16xi8>
    %3 = vector.shape_cast %0 : vector<8x32xf32> to vector<8x1x32xf32>
    %4 = vector.broadcast %3 : vector<8x1x32xf32> to vector<8x16x32xf32>
    %5 = arith.mulf %1, %4 : vector<8x16x32xf32>
    %cst = arith.constant dense<0.000000e+00> : vector<8x16xf32>
    %6 = vector.multi_reduction <add>, %5, %cst [2] : vector<8x16x32xf32> to vector<8x16xf32>
    %7 = arith.extsi %2 : vector<8x16xi8> to vector<8x16xi32>
    %c0_i32 = arith.constant 0 : i32
    %8 = vector.broadcast %c0_i32 : i32 to vector<8x16xi32>
    %9 = arith.cmpi eq, %7, %8 : vector<8x16xi32>
    %cst_6 = arith.constant 0xFF800000 : f32
    %10 = vector.broadcast %cst_6 : f32 to vector<8x16xf32>
    %11 = arith.select %9, %10, %6 : vector<8x16xi1>, vector<8x16xf32>
    %cst_7 = arith.constant dense<0xFF800000> : vector<8xf32>
    %12 = vector.multi_reduction <maximumf>, %11, %cst_7 [1] : vector<8x16xf32> to vector<8xf32>
    %13 = vector.shape_cast %12 : vector<8xf32> to vector<8x1xf32>
    %14 = vector.broadcast %13 : vector<8x1xf32> to vector<8x16xf32>
    %15 = arith.subf %11, %14 : vector<8x16xf32>
    %16 = math.exp %15 : vector<8x16xf32>
    %cst_8 = arith.constant dense<0.000000e+00> : vector<8xf32>
    %17 = vector.multi_reduction <add>, %16, %cst_8 [1] : vector<8x16xf32> to vector<8xf32>
    %18 = vector.shape_cast %17 : vector<8xf32> to vector<8x1xf32>
    %19 = vector.broadcast %18 : vector<8x1xf32> to vector<8x16xf32>
    %20 = arith.divf %16, %19 : vector<8x16xf32>
    %21 = vector.shape_cast %20 : vector<8x16xf32> to vector<8x16x1xf32>
    %22 = vector.broadcast %21 : vector<8x16x1xf32> to vector<8x16x32xf32>
    %23 = arith.mulf %22, %1 : vector<8x16x32xf32>
    %cst_9 = arith.constant dense<0.000000e+00> : vector<8x32xf32>
    %24 = vector.multi_reduction <add>, %23, %cst_9 [1] : vector<8x16x32xf32> to vector<8x32xf32>
    %c0_10 = arith.constant 0 : index
    %c0_11 = arith.constant 0 : index
    %25 = vector.load %arg4[%c0_10, %c0_11] : memref<8x32xf32, #tpu.memory_space<vmem>>, vector<8x32xf32>
    tpu.vector_store %arg4[%c0_10, %c0_11], %24 {strides = array<i32>} : memref<8x32xf32, #tpu.memory_space<vmem>>, vector<8x32xf32>,
    %c0_12 = arith.constant 0 : index
    %c0_13 = arith.constant 0 : index
    %26 = vector.load %arg5[%c0_12, %c0_13] : memref<8x16xf32, #tpu.memory_space<vmem>>, vector<8x16xf32>
    tpu.vector_store %arg5[%c0_12, %c0_13], %20 {strides = array<i32>} : memref<8x16xf32, #tpu.memory_space<vmem>>, vector<8x16xf32>,
    return
  }
  func.func @transform_0(%arg0: i32) -> (i32, i32) {
    %c0_i32 = arith.constant 0 : i32
    %c0_i32_0 = arith.constant 0 : i32
    return %arg0, %c0_i32 : i32, i32
  }
  func.func @transform_1(%arg0: i32) -> (i32, i32, i32) {
    %c0_i32 = arith.constant 0 : i32
    %c0_i32_0 = arith.constant 0 : i32
    %c0_i32_1 = arith.constant 0 : i32
    return %arg0, %c0_i32, %c0_i32_0 : i32, i32, i32
  }
  func.func @transform_2(%arg0: i32) -> (i32, i32) {
    %c0_i32 = arith.constant 0 : i32
    %c0_i32_0 = arith.constant 0 : i32
    return %arg0, %c0_i32 : i32, i32
  }
  func.func @transform_3(%arg0: i32) -> (i32, i32) {
    %c0_i32 = arith.constant 0 : i32
    %c0_i32_0 = arith.constant 0 : i32
    return %arg0, %c0_i32 : i32, i32
  }
  func.func @transform_4(%arg0: i32) -> (i32, i32) {
    %c0_i32 = arith.constant 0 : i32
    %c0_i32_0 = arith.constant 0 : i32
    return %arg0, %c0_i32 : i32, i32
  }
}

</mosaic_0001>

<bundles_post_ra>
// kernel: tpu_custom_call.1
= control target key start
LH: loop header
LB: loop body
LE: loop exit
PB: predicated region body
PF: predicated region fallthrough
CT: control target
= control target key end

     0   :  { %10 = vsyncpa [#allocation3], 0  ;;  %s1643_s0 = inlined_call_operand.hbm [shape: f32[16,32], index: 0, kind: input, shape index: {}]   ;;  %s1644_s1 = inlined_call_operand.hbm [shape: f32[16,16,32], index: 1, kind: input, shape index: {}]   ;;  %s1645_s2 = inlined_call_operand.vmem [shape: s8[16,16], index: 2, kind: input, shape index: {}]   ;;  %s1646_s3 = inlined_call_operand.hbm [shape: f32[16,32], index: 3, kind: output, shape index: {0}]   ;;  %s1647_s4 = inlined_call_operand.hbm [shape: f32[16,16], index: 4, kind: output, shape index: {1}]  }
   0x1   :  { %12 = vsyncpa [#allocation3 + $0x1], 0 }
   0x2   :  { %13 = vsyncpa [#allocation6], 0 }
   0x3   :  { %15 = vsyncpa [#allocation6 + $0x1], 0 }
   0x4   :  { %16 = vsyncpa [#allocation4], 0 }
   0x5   :  { %18 = vsyncpa [#allocation4 + $0x1], 0 }
   0x6   :  { %19 = vsyncpa [#allocation9], 0 }
   0x7   :  { %21 = vsyncpa [#allocation9 + $0x1], 0  ;;  %s1224_s15 = smov 0   ;;  %s1226_s16 = smov 0  }
   0x8   :  { %s1228_s17 = smov 0   ;;  %s1230_s18 = smov 0  }
   0x9 LB: > { %s1245_s19 = sadd.s32 4294967295, %s1190_s18   ;;  %s941_s20 = sadd.s32 4294967294, %s1190_s18   ;;  %s1190_s18 = sphi %s1230_s18, %s1665_s18   ;;  %s1186_s17 = sphi %s1228_s17, %s1664_s17   ;;  %s1182_s16 = sphi %s1226_s16, %s1663_s16   ;;  %s1178_s15 = sphi %s1224_s15, %s1662_s15  }
   0xa   : > { %s1249_s21 = sadd.s32 1, %s1190_s18   ;;  %s34_s22 = sadd.s32 1, %s1186_s17 }
   0xb   : > { %s31_s23 = ssub.s32 %s1190_s18, %s1249_s21  ;;  %p41_p0 = scmp.ne.s32.totalorder %s1186_s17, %s1182_s16 }
   0xc   : > { %p32_p1 = scmp.eq.s32.totalorder %s31_s23, 0  ;;  %p42_p2 = scmp.eq.s32.totalorder %s1190_s18, 0 }
   0xd   : > { %p47_p3 = scmp.ne.s32.totalorder %s1182_s16, %s1178_s15  ;;  %p48_p4 = scmp.eq.s32.totalorder %s1245_s19, 0 }
   0xe   : > { %s1261_s24 = scalar_select %p32_p1, %s1186_s17, %s34_s22  }
   0xf   : > { %p1263_p5 = por %p42_p2, %p41_p0  ;;  %p1267_p6 = por %p48_p4, %p47_p3 }
  0x10   : > { %p123_p7 = scmp.eq.s32.totalorder %s1245_s19, 1  ;;  %p129_p8 = scmp.eq.s32.totalorder %s941_s20, 1 }
  0x11   : > { %s1651_s26 = scalar_select %p1267_p6, 1, 0 }
  0x12   : > { %p986_p10 = scmp.lt.s32.totalorder %s1190_s18, 2  ;;  %p1274_p11 = por %p123_p7, %p41_p0 }
  0x13   : > { %p1278_p12 = por %p129_p8, %p47_p3  ;;  %s1283_s29 = sand.u32 1, %s1186_s17  }
  0x14   : > { %s1652_s27 = scalar_select %p1274_p11, 1, 0 }
  0x15   : > { %s1653_s28 = scalar_select %p1278_p12, 1, 0 }
  0x16   : > { %s945_s30 = sshll.u32 %s1190_s18, 7  ;;  %s944_s5 = sshll.u32 %s1283_s29, 3 }
  0x17   : > { %s1290_s8 = scalar_lea.hbm %s1643_s0, %s945_s30  ;;  %s179_s9 = scalar_lea.vmem [#allocation2], %s944_s5 }
  0x18   : > { %s186_s10 = sshll.u32 %s179_s9, 4  ;;  %p1294_p13 = pnand %p986_p10, %p1263_p5  ;;  %s1298_s10 = int_to_ptr.vmem [resolvable:$true] %s186_s10 }
  0x19   : > { %s176_s12 = scalar_lea.sflag [#allocation3], %s1283_s29  ;;  %s1028_s13 = scalar_lea.hbm %s1290_s8, 128 }
  0x1a   : > { %p1029_p2 = scmp.ne.s32.totalorder %s1290_s8, %s1028_s13  ;;  %p1030_p3 = pneg %p1294_p13 }
  0x1b   : > { %s1033_s22 = scalar_lea.hbm %s1643_s0, 256  ;;  %p1034_p5 = scmp.lt.u32.totalorder %s1290_s8, %s1643_s0 }
  0x1c   : > { %p1031_p4 = pnand %p1030_p3, %p1029_p2  ;;  %p1035_p8 = scmp.lt.u32.totalorder %s1033_s22, %s1028_s13 }
  0x1d   : > { %p1037_p9 = scmp.lt.u32.totalorder %s1028_s13, %s1290_s8 }
  0x1e   : > { %p1032_p7 = pneg %p1031_p4  ;;  %p1036_p10 = por %p1035_p8, %p1034_p5 }
  0x20   : > { %p1038_p0 = por %p1037_p9, %p1036_p10 }
  0x22   : > { %p1039_p1 = pnand %p1038_p0, %p1032_p7 }
  0x24   : > { %1042 = shalt.err (!%p1039_p1)
}
  0x25   : > { %s1043_s30 = scalar_lea.vmem %s1298_s10, 128  ;;  %s1192_s5 = smov [#allocation2]  }
  0x26   : > { %p1044_p2 = scmp.ne.s32.totalorder %s1298_s10, %s1043_s30  ;;  %s1048_s6 = sshll.u32 %s1192_s5, 4  ;;  %s1049_s6 = int_to_ptr.vmem [resolvable:$false] %s1048_s6 }
  0x27   : > { %s1050_s7 = scalar_lea.vmem %s1049_s6, 256  ;;  %p1051_p11 = scmp.lt.s32.totalorder %s1298_s10, %s1049_s6 }
  0x28   : > { %p1046_p4 = pnand %p1044_p2, %p1030_p3  ;;  %p1052_p5 = scmp.lt.s32.totalorder %s1050_s7, %s1043_s30 }
  0x2a   : > { %p1047_p12 = pneg %p1046_p4  ;;  %p1053_p8 = por %p1052_p5, %p1051_p11 }
  0x2c   : > { %p1054_p9 = pnand %p1053_p8, %p1047_p12 }
  0x2e   : > { %1057 = shalt.err (!%p1054_p9)
}
  0x2f   : > { %975 = dma.hbm_to_vmem [thread:$0]  (!%p1294_p13), %s1290_s8, 128, %s1298_s10, %s176_s12  }
  0x30   : > { %p1655_p0 = scmp.lt.s32.totalorder %s1190_s18, 3  ;;  %p1656_p1 = scmp.ge.s32.totalorder %s1190_s18, 1 }
  0x31   : > { %s946_s13 = sshll.u32 %s1283_s29, 7  ;;  %s963_s14 = sshll.u32 %s1190_s18, 11 }
  0x32   : > { %p1332_p7 = pnand %p1656_p1, %p1655_p0  ;;  %s1341_s23 = scalar_lea.hbm %s1644_s1, %s963_s14 }
  0x33   : > { %s197_s25 = scalar_lea.vmem [#allocation5], %s946_s13  ;;  %s194_s8 = scalar_lea.sflag [#allocation6], %s1283_s29 }
  0x34   : > { %s205_s30 = sshll.u32 %s197_s25, 4  ;;  %s1058_s10 = scalar_lea.hbm %s1341_s23, 2048  ;;  %s1343_s30 = int_to_ptr.vmem [resolvable:$true] %s205_s30 }
  0x35   : > { %p1059_p11 = scmp.ne.s32.totalorder %s1341_s23, %s1058_s10  ;;  %s1063_s6 = scalar_lea.hbm %s1644_s1, 4096 }
  0x36   : > { %p1064_p2 = scmp.lt.u32.totalorder %s1341_s23, %s1644_s1  ;;  %p1065_p4 = scmp.lt.u32.totalorder %s1063_s6, %s1058_s10 }
  0x37   : > { %p1061_p12 = pnand %p1059_p11, %p1030_p3  ;;  %p1067_p8 = scmp.lt.u32.totalorder %s1058_s10, %s1341_s23 }
  0x38   : > { %p1066_p5 = por %p1065_p4, %p1064_p2 }
  0x39   : > { %p1062_p10 = pneg %p1061_p12 }
  0x3a   : > { %p1068_p9 = por %p1067_p8, %p1066_p5 }
  0x3c   : > { %p1069_p0 = pnand %p1068_p9, %p1062_p10 }
  0x3e   : > { %1072 = shalt.err (!%p1069_p0)
}
  0x3f   : > { %s1073_s13 = scalar_lea.vmem %s1343_s30, 2048  ;;  %s1193_s20 = smov [#allocation5]  }
  0x40   : > { %p1074_p1 = scmp.ne.s32.totalorder %s1343_s30, %s1073_s13  ;;  %s1078_s22 = sshll.u32 %s1193_s20, 4  ;;  %s1079_s22 = int_to_ptr.vmem [resolvable:$false] %s1078_s22 }
  0x41   : > { %s1080_s25 = scalar_lea.vmem %s1079_s22, 4096  ;;  %p1081_p6 = scmp.lt.s32.totalorder %s1343_s30, %s1079_s22 }
  0x42   : > { %p1076_p11 = pnand %p1074_p1, %p1030_p3  ;;  %p1082_p2 = scmp.lt.s32.totalorder %s1080_s25, %s1073_s13 }
  0x44   : > { %p1077_p12 = pneg %p1076_p11  ;;  %p1083_p4 = por %p1082_p2, %p1081_p6 }
  0x46   : > { %p1084_p5 = pnand %p1083_p4, %p1077_p12 }
  0x48   : > { %1087 = shalt.err (!%p1084_p5)
}
  0x49   : > { %s1194_s10 = smov 128   ;;  %s1195_s12 = smov 8  }
  0x4a   : > { %978 = dma.hbm_to_vmem [thread:$0]  (!%p1294_p13), %s1341_s23, 2048, %s1343_s30, %s194_s8, %s1194_s10, %s1194_s10, %s1195_s12  }
  0x4b   : > { %224 = sbr.rel (%p1332_p7) target bundleno = 774 (0x306), region = 32  ;;  %s1374_s5 = sand.u32 (!%p1332_p7), 1, %s1182_s16  }
  0x4c   : > { %s1377_s6 = sshll.u32 (!%p1332_p7), %s1374_s5, 3  ;;  %s227_s7 = scalar_lea.sflag (!%p1332_p7), [#allocation3], %s1374_s5 }
  0x4d   : > { %s230_s14 = scalar_lea.vmem (!%p1332_p7), [#allocation2], %s1377_s6  ;;  %p1658_p6 = scmp.ne.s32.totalorder (!%p1332_p7), %s1651_s26, 0 }
  0x52   : > { %1161 = dma.done.wait (%p1658_p6), %s227_s7, 128  }
  0x53   : > { %1163 = vsyncadd (%p1658_p6), %s227_s7, 4294967168  ;;  %s952_s29 = sshll.u32 %s1374_s5, 7  ;;  %s236_s11 = scalar_lea.sflag [#allocation6], %s1374_s5 }
  0x54   : > { %s1387_s9 = scalar_lea.vmem [#allocation5], %s952_s29 }
  0x55   : > { %1165 = dma.done.wait (%p1658_p6), %s236_s11, 2048  }
  0x56   : > { %1167 = vsyncadd (%p1658_p6), %s236_s11, 4294965248  ;;  %v306_v0 = vlaneseq  ;;  %v1196_v1 = vmov 1966171168   ;;  %v283_v6 = vld [vmem:[%s230_s14] sm:$0xff]  ;;  %v1401_v13 = vld [vmem:[%s1387_s9] sm:$0xff]  ;;  %vm407_vm0 = vcmask 261120  }
  0x57   : > { %v304_v2 = vunpack.c.l.s4 %v1196_v1  ;;  %v302_v9 = vcombine.high %v283_v6, %v283_v6  ;;  %v1404_v14 = vld [vmem:[%s1387_s9 + $0x8] sm:$0xff]  ;;  %v1408_v18 = vld [vmem:[%s1387_s9 + $0x10] sm:$0xff]  ;;  %v1411_v19 = vld [vmem:[%s1387_s9 + $0x18] sm:$0xff]  ;;  %p279_p13 = scmp.lt.s32.totalorder %s1245_s19, 1  ;;  %vm485_vm1 = vcmask 130112   ;;  %vm550_vm2 = vcmask 1041409  }
  0x58   : > { %v1394_v3 = vshrl.u32 %v306_v0, 7  ;;  %v1418_v25 = vld [vmem:[%s1387_s9 + $0x20] sm:$0xff]  ;;  %v1424_v29 = vld [vmem:[%s1387_s9 + $0x28] sm:$0xff]  ;;  %v1442_v44 = vld [vmem:[%s1387_s9 + $0x30] sm:$0xff]  ;;  %vm552_vm3 = vcmask 1042434   ;;  %vm554_vm4 = vcmask 1043459  }
  0x59   : > { %v305_v4 = vunpack.c.0.s8 %v304_v2  ;;  %v1431_v36 = vld [vmem:[%s1387_s9 + $0x40] sm:$0xff]  ;;  %v1436_v39 = vld [vmem:[%s1387_s9 + $0x48] sm:$0xff]  ;;  %v1447_v47 = vld [vmem:[%s1387_s9 + $0x38] sm:$0xff]  ;;  %s280_s26 = scalar_select %p279_p13, %s1245_s19, 1  ;;  %vm556_vm5 = vcmask 1044484   ;;  %vm558_vm6 = vcmask 1045509  }
  0x5a   : > { %v1398_v8 = vsub.s32 0, %v1394_v3  ;;  %v1453_v52 = vld [vmem:[%s1387_s9 + $0x50] sm:$0xff]  ;;  %v1458_v55 = vld [vmem:[%s1387_s9 + $0x58] sm:$0xff]  ;;  %v1464_v60 = vld [vmem:[%s1387_s9 + $0x60] sm:$0xff]  ;;  %vm560_vm7 = vcmask 1046534   ;;  %vm562_vm8 = vcmask 1047559  }
  0x5b   : > { %v308_v5 = vsub.s32 %v305_v4, %v1394_v3  ;;  %v1469_v63 = vld [vmem:[%s1387_s9 + $0x68] sm:$0xff]  ;;  %s955_s23 = sshll.u32 %s280_s26, 1  ;;  %vm566_vm10 = vcmask 130048   ;;  %s277_s20 = scalar_lea.vmem [#allocation8], %s1377_s6 }
  0x5c   : > { %s282_s13 = scalar_lea.vmem %s1645_s2, %s955_s23  ;;  %s958_s22 = sshll.u32 %s1245_s19, 7 }
  0x5d   : > { %v309_v7 = vrot.slane %v283_v6, %v308_v5  ;;  %v316_v12 = vrot.slane %v302_v9, %v308_v5  ;;  %v1480_v9 = vld [vmem:[%s1387_s9 + $0x78] sm:$0xff]  ;;  %s1531_s12 = scalar_lea.hbm %s1647_s4, %s958_s22  ;;  %s804_s7 = sshll.u32 %s277_s20, 4  ;;  %s805_s7 = int_to_ptr.vmem [resolvable:$true] %s804_s7 }
  0x5e   : > { %s778_s14 = scalar_lea.sflag [#allocation9], %s1374_s5  ;;  %s1088_s29 = scalar_lea.vmem %s805_s7, 128 }
  0x5f   : > { %v325_v10 = vrot.slane %v309_v7, %v308_v5  ;;  %v317_v11 = vcombine.high %v309_v7, %v309_v7  ;;  %v332_v20 = vrot.slane %v316_v12, %v308_v5  ;;  %v318_v31 = vcombine.high %v316_v12, %v316_v12  ;;  %p1089_p3 = scmp.ne.s32.totalorder %s805_s7, %s1088_s29  ;;  %p1659_p7 = scmp.ne.s32.totalorder %s1652_s27, 0 }
  0x60   : > { %s1197_s11 = smov [#allocation8]  }
  0x61   : > { %v354_v15 = vrot.slane %v325_v10, %v1398_v8  ;;  %v339_v16 = vrot.slane %v317_v11, %v308_v5  ;;  %v347_v17 = vcombine.high %v325_v10, %v325_v10  ;;  %v370_v30 = vrot.slane %v332_v20, %v1398_v8  ;;  %p1090_p10 = pnand %p1089_p3, %p1659_p7 }
  0x62   : > { %v346_v43 = vrot.slane %v318_v31, %v308_v5  ;;  %v348_v51 = vcombine.high %v332_v20, %v332_v20  ;;  %v1475_v5 = vld [vmem:[%s1387_s9 + $0x70] sm:$0xff]  ;;  %s1092_s9 = sshll.u32 %s1197_s11, 4  ;;  %s1093_s9 = int_to_ptr.vmem [resolvable:$false] %s1092_s9 }
  0x63   : > { %v391_v21 = vmul.f32 %v354_v15, %v1401_v13  ;;  %v358_v22 = vrot.slane %v339_v16, %v1398_v8  ;;  %v392_v23 = vmul.f32 %v354_v15, %v1404_v14  ;;  %v362_v24 = vrot.slane %v347_v17, %v1398_v8  ;;  %p1091_p8 = pneg %p1090_p10  ;;  %s1094_s26 = scalar_lea.vmem %s1093_s9, 256 }
  0x64   : > { %v349_v35 = vcombine.high %v339_v16, %v339_v16  ;;  %v399_v41 = vmul.f32 %v370_v30, %v1431_v36  ;;  %v400_v46 = vmul.f32 %v370_v30, %v1436_v39  ;;  %v374_v50 = vrot.slane %v346_v43, %v1398_v8  ;;  %p1095_p9 = scmp.lt.s32.totalorder %s805_s7, %s1093_s9  ;;  %p1096_p0 = scmp.lt.s32.totalorder %s1094_s26, %s1088_s29 }
  0x65   : > { %v408_v26 = vsel %vm407_vm0, %v391_v21, 0.0  ;;  %v393_v27 = vmul.f32 %v358_v22, %v1408_v18  ;;  %v394_v28 = vmul.f32 %v358_v22, %v1411_v19  ;;  %v411_v33 = vsel %vm407_vm0, %v392_v23, 0.0 }
  0x66   : > { %409 = vadd.xlane.f32.xlu0 %v408_v26  ;;  %v395_v34 = vmul.f32 %v362_v24, %v1418_v25  ;;  %v396_v38 = vmul.f32 %v362_v24, %v1424_v29  ;;  %v366_v42 = vrot.slane %v349_v35, %v1398_v8  ;;  %v432_v48 = vsel %vm407_vm0, %v399_v41, 0.0  ;;  %p1097_p1 = por %p1096_p0, %p1095_p9 }
  0x67   : > { %v414_v32 = vsel %vm407_vm0, %v393_v27, 0.0  ;;  %v417_v37 = vsel %vm407_vm0, %v394_v28, 0.0  ;;  %v435_v53 = vsel %vm407_vm0, %v400_v46, 0.0  ;;  %v401_v57 = vmul.f32 %v374_v50, %v1453_v52 }
  0x68   : > { %415 = vadd.xlane.f32.xlu1 %v414_v32  ;;  %v420_v40 = vsel %vm407_vm0, %v395_v34, 0.0  ;;  %v423_v45 = vsel %vm407_vm0, %v396_v38, 0.0  ;;  %v397_v49 = vmul.f32 %v366_v42, %v1442_v44  ;;  %v398_v54 = vmul.f32 %v366_v42, %v1447_v47  ;;  %p1098_p11 = pnand %p1097_p1, %p1091_p8 }
  0x69   : > { %v378_v58 = vrot.slane %v348_v51, %v1398_v8  ;;  %v350_v59 = vcombine.high %v346_v43, %v346_v43  ;;  %v402_v62 = vmul.f32 %v374_v50, %v1458_v55  ;;  %v438_v1 = vsel %vm407_vm0, %v401_v57, 0.0 }
  0x6a   : > { %412 = vadd.xlane.f32.xlu0 %v411_v33  ;;  %v426_v56 = vsel %vm407_vm0, %v397_v49, 0.0  ;;  %v429_v61 = vsel %vm407_vm0, %v398_v54, 0.0  ;;  %v475_v26 = vand.u32 127, %v306_v0 }
  0x6b   : > { %v403_v2 = vmul.f32 %v378_v58, %v1464_v60  ;;  %v382_v4 = vrot.slane %v350_v59, %v1398_v8  ;;  %v441_v6 = vsel %vm407_vm0, %v402_v62, 0.0  ;;  %v404_v7 = vmul.f32 %v378_v58, %v1469_v63  ;;  %v300_v58 = vld [vmem:[%s282_s13] sm:$0x3] }
  0x6c   : > { %418 = vadd.xlane.f32.xlu1 %v417_v37  ;;  %v480_v30 = vadd.s32 4294967288, %v475_v26  ;;  %v478_v33 = vsub.s32 %v475_v26, %v1394_v3 }
  0x6d   : > { %v444_v10 = vsel %vm407_vm0, %v403_v2, 0.0  ;;  %v405_v11 = vmul.f32 %v382_v4, %v1475_v5  ;;  %v447_v12 = vsel %vm407_vm0, %v404_v7, 0.0  ;;  %v406_v15 = vmul.f32 %v382_v4, %v1480_v9 }
  0x6e   : > { %421 = vadd.xlane.f32.xlu0 %v420_v40  ;;  %v483_v34 = vsub.s32 %v480_v30, %v1394_v3 }
  0x6f   : > { %v450_v16 = vsel %vm407_vm0, %v405_v11, 0.0  ;;  %v453_v17 = vsel %vm407_vm0, %v406_v15, 0.0  ;;  %v456_v11 = vunpack.c.0.s8 %v300_v58 }
  0x70   : > { %424 = vadd.xlane.f32.xlu1 %v423_v45 }
  0x71   : > { %vm457_vm9 = vcmp.eq.s32.totalorder %v456_v11, 0 }
  0x72   : > { %433 = vadd.xlane.f32.xlu0 %v432_v48 }
  0x74   : > { %436 = vadd.xlane.f32.xlu1 %v435_v53 }
  0x76   : > { %427 = vadd.xlane.f32.xlu0 %v426_v56 }
  0x78   : > { %430 = vadd.xlane.f32.xlu1 %v429_v61 }
  0x7a   : > { %439 = vadd.xlane.f32.xlu0 %v438_v1 }
  0x7c   : > { %442 = vadd.xlane.f32.xlu1 %v441_v6 }
  0x7e   : > { %445 = vadd.xlane.f32.xlu0 %v444_v10 }
  0x80   : > { %448 = vadd.xlane.f32.xlu1 %v447_v12 }
  0x82   : > { %451 = vadd.xlane.f32.xlu0 %v450_v16 }
  0x84   : > { %454 = vadd.xlane.f32.xlu1 %v453_v17 }
  0xf3   : > { %v410_v20 = vpop.xlane.xlu0 %409 }
  0xf4   : > { %v479_v48 = vrot.slane %v410_v20, %v478_v33 }
  0xf5   : > { %v416_v21 = vpop.xlane.xlu1 %415 }
  0xf6   : > { %v490_v42 = vrot.slane %v416_v21, %v478_v33 }
  0xf7   : > { %v413_v22 = vpop.xlane.xlu0 %412 }
  0xf8   : > { %v484_v43 = vrot.slane %v413_v22, %v483_v34 }
  0xf9   : > { %v419_v23 = vpop.xlane.xlu1 %418 }
  0xfa   : > { %v494_v37 = vrot.slane %v419_v23, %v483_v34  ;;  %v486_v53 = vsel %vm485_vm1, %v484_v43, %v479_v48  ;;  %v602_v43 = vsub.s32 2, %v1394_v3 }
  0xfb   : > { %v422_v24 = vpop.xlane.xlu0 %421 }
  0xfc   : > { %v499_v38 = vrot.slane %v422_v24, %v478_v33  ;;  %v495_v49 = vsel %vm485_vm1, %v494_v37, %v490_v42  ;;  %v591_v42 = vsub.s32 1, %v1394_v3 }
  0xfd   : > { %v425_v27 = vpop.xlane.xlu1 %424  ;;  %v551_v59 = vsel %vm550_vm2, %v495_v49, %v486_v53  ;;  %v624_v49 = vsub.s32 4, %v1394_v3  ;;  %v646_v53 = vsub.s32 6, %v1394_v3 }
  0xfe   : > { %v503_v40 = vrot.slane %v425_v27, %v483_v34 }
  0xff   : > { %v434_v28 = vpop.xlane.xlu0 %433 }
 0x100   : > { %v504_v50 = vsel %vm485_vm1, %v503_v40, %v499_v38  ;;  %v517_v62 = vrot.slane %v434_v28, %v478_v33 }
 0x101   : > { %v437_v31 = vpop.xlane.xlu1 %436  ;;  %v553_v4 = vsel %vm552_vm3, %v504_v50, %v551_v59  ;;  %v635_v50 = vsub.s32 5, %v1394_v3 }
 0x102   : > { %v521_v61 = vrot.slane %v437_v31, %v483_v34 }
 0x103   : > { %v428_v32 = vpop.xlane.xlu0 %427 }
 0x104   : > { %v508_v45 = vrot.slane %v428_v32, %v478_v33  ;;  %v522_v16 = vsel %vm485_vm1, %v521_v61, %v517_v62 }
 0x105   : > { %v431_v35 = vpop.xlane.xlu1 %430 }
 0x106   : > { %v512_v0 = vrot.slane %v431_v35, %v483_v34 }
 0x107   : > { %v440_v41 = vpop.xlane.xlu0 %439 }
 0x108   : > { %v513_v54 = vsel %vm485_vm1, %v512_v0, %v508_v45  ;;  %v526_v57 = vrot.slane %v440_v41, %v478_v33 }
 0x109   : > { %v443_v46 = vpop.xlane.xlu1 %442  ;;  %v555_v7 = vsel %vm554_vm4, %v513_v54, %v553_v4 }
 0x10a   : > { %v530_v56 = vrot.slane %v443_v46, %v483_v34  ;;  %v557_v22 = vsel %vm556_vm5, %v522_v16, %v555_v7  ;;  %v613_v46 = vsub.s32 3, %v1394_v3 }
 0x10b   : > { %v446_v51 = vpop.xlane.xlu0 %445 }
 0x10c   : > { %v535_v2 = vrot.slane %v446_v51, %v478_v33  ;;  %v531_v12 = vsel %vm485_vm1, %v530_v56, %v526_v57  ;;  %v657_v56 = vsub.s32 7, %v1394_v3 }
 0x10d   : > { %v449_v1 = vpop.xlane.xlu1 %448  ;;  %v559_v23 = vsel %vm558_vm6, %v531_v12, %v557_v22 }
 0x10e   : > { %v539_v6 = vrot.slane %v449_v1, %v483_v34 }
 0x10f   : > { %v452_v10 = vpop.xlane.xlu0 %451 }
 0x110   : > { %v544_v15 = vrot.slane %v452_v10, %v478_v33  ;;  %v540_v17 = vsel %vm485_vm1, %v539_v6, %v535_v2 }
 0x111   : > { %v455_v20 = vpop.xlane.xlu1 %454  ;;  %v561_v26 = vsel %vm560_vm7, %v540_v17, %v559_v23 }
 0x112   : > { %v548_v21 = vrot.slane %v455_v20, %v483_v34 }
 0x114   : > { %v549_v24 = vsel %vm485_vm1, %v548_v21, %v544_v15 }
 0x115   : > { %v563_v27 = vsel %vm562_vm8, %v549_v24, %v561_v26 }
 0x116   : > { %v565_v28 = vsel %vm457_vm9, -inf, %v563_v27 }
 0x117   : > { %v567_v30 = vsel %vm566_vm10, %v565_v28, -inf }
 0x118   : > { %568 = vmax.xlane.f32.xlu0 %v567_v30 }
 0x1a5   : > { %v569_v31 = vpop.xlane.xlu0 %568 }
 0x1a6   : > { %v570_v32 = vsub.f32 %v565_v28, %v569_v31 }
 0x1a8   : > { %v571_v33 = vmul.f32 1.442695, %v570_v32 }
 0x1aa   : > { %1024 = vpow2.f32 %v571_v33 }
 0x1b4   : > { %v1025_v34 = vpop.eup %1024 }
 0x1b5   : > { %v573_v35 = vsel %vm566_vm10, %v1025_v34, 0.0 }
 0x1b6   : > { %574 = vadd.xlane.f32.xlu1 %v573_v35 }
 0x243   : > { %v575_v37 = vpop.xlane.xlu1 %574 }
 0x244   : > { %1026 = vrcp.f32 %v575_v37 }
 0x24e   : > { %v1027_v38 = vpop.eup %1026 }
 0x24f   : > { %v577_v40 = vmul.f32 %v1027_v38, %v1025_v34 }
 0x251   : > { %v581_v41 = vrot.slane %v577_v40, %v1398_v8  ;;  %771 = vst.msk [vmem:[%s277_s20] sm:$0xff] %vm566_vm10, %v577_v40  ;;  %v592_v0 = vrot.slane %v577_v40, %v591_v42  ;;  %v603_v45 = vrot.slane %v577_v40, %v602_v43  ;;  %v614_v48 = vrot.slane %v577_v40, %v613_v46 }
 0x252   : > { %v625_v8 = vrot.slane %v577_v40, %v624_v49  ;;  %v636_v51 = vrot.slane %v577_v40, %v635_v50  ;;  %v647_v54 = vrot.slane %v577_v40, %v646_v53  ;;  %v658_v57 = vrot.slane %v577_v40, %v657_v56 }
 0x253   : > { %587 = vbcast.lane.b32.xlu1 %v581_v41, 264  ;;  %583 = vbcast.lane.b32.xlu0 %v581_v41, 256 }
 0x257   : > { %594 = vbcast.lane.b32.xlu1 %v592_v0, 256  ;;  %605 = vbcast.lane.b32.xlu0 %v603_v45, 256 }
 0x25b   : > { %598 = vbcast.lane.b32.xlu1 %v592_v0, 264  ;;  %616 = vbcast.lane.b32.xlu0 %v614_v48, 256 }
 0x25f   : > { %609 = vbcast.lane.b32.xlu1 %v603_v45, 264  ;;  %627 = vbcast.lane.b32.xlu0 %v625_v8, 256 }
 0x263   : > { %620 = vbcast.lane.b32.xlu1 %v614_v48, 264  ;;  %638 = vbcast.lane.b32.xlu0 %v636_v51, 256 }
 0x267   : > { %631 = vbcast.lane.b32.xlu1 %v625_v8, 264  ;;  %649 = vbcast.lane.b32.xlu0 %v647_v54, 256 }
 0x26b   : > { %642 = vbcast.lane.b32.xlu1 %v636_v51, 264  ;;  %660 = vbcast.lane.b32.xlu0 %v658_v57, 256 }
 0x26f   : > { %653 = vbcast.lane.b32.xlu1 %v647_v54, 264 }
 0x273   : > { %664 = vbcast.lane.b32.xlu1 %v658_v57, 264 }
 0x274   : > { %1101 = shalt.err (!%p1098_p11)
}
 0x275   : > { %s1102_s23 = scalar_lea.hbm %s1531_s12, 128  ;;  %s1106_s13 = scalar_lea.hbm %s1647_s4, 256 }
 0x276   : > { %p1103_p12 = scmp.ne.s32.totalorder %s1531_s12, %s1102_s23  ;;  %p1107_p5 = scmp.lt.u32.totalorder %s1531_s12, %s1647_s4 }
 0x277   : > { %p1108_p6 = scmp.lt.u32.totalorder %s1106_s13, %s1102_s23  ;;  %p1110_p3 = scmp.lt.u32.totalorder %s1102_s23, %s1531_s12 }
 0x278   : > { %p1104_p2 = pnand %p1103_p12, %p1659_p7 }
 0x279   : > { %p1109_p13 = por %p1108_p6, %p1107_p5 }
 0x27a   : > { %p1105_p4 = pneg %p1104_p2 }
 0x27b   : > { %p1111_p10 = por %p1110_p3, %p1109_p13 }
 0x27d   : > { %p1112_p8 = pnand %p1111_p10, %p1105_p4 }
 0x27f   : > { %1115 = shalt.err (!%p1112_p8)
}
 0x280   : > { %969 = dma.vmem_to_hbm [thread:$0]  (%p1659_p7), %s805_s7, 128, %s1531_s12, %s778_s14  }
 0x281   : > { %s270_s10 = scalar_lea.vmem [#allocation7], %s1377_s6  ;;  %s1597_s29 = scalar_lea.hbm %s1646_s3, %s958_s22 }
 0x282   : > { %s791_s12 = sshll.u32 %s270_s10, 4  ;;  %s773_s6 = scalar_lea.sflag [#allocation4], %s1374_s5  ;;  %s1599_s12 = int_to_ptr.vmem [resolvable:$true] %s791_s12 }
 0x283   : > { %s1116_s11 = scalar_lea.vmem %s1599_s12, 128  ;;  %s1198_s19 = smov [#allocation7]  }
 0x284   : > { %p1117_p9 = scmp.ne.s32.totalorder %s1599_s12, %s1116_s11  ;;  %s1120_s9 = sshll.u32 %s1198_s19, 4  ;;  %s1121_s9 = int_to_ptr.vmem [resolvable:$false] %s1120_s9 }
 0x285   : > { %s1122_s22 = scalar_lea.vmem %s1121_s9, 256  ;;  %p1123_p11 = scmp.lt.s32.totalorder %s1599_s12, %s1121_s9 }
 0x286   : > { %p1118_p0 = pnand %p1117_p9, %p1659_p7  ;;  %p1124_p12 = scmp.lt.s32.totalorder %s1122_s22, %s1116_s11 }
 0x288   : > { %p1119_p1 = pneg %p1118_p0  ;;  %p1125_p2 = por %p1124_p12, %p1123_p11 }
 0x28a   : > { %p1126_p4 = pnand %p1125_p2, %p1119_p1 }
 0x2c5   : > { %v588_v3 = vpop.permute.xlu1 %587  ;;  %v584_v58 = vpop.permute.xlu0 %583 }
 0x2c6   : > { %v667_v4 = vmul.f32 %v588_v3, %v1404_v14  ;;  %v666_v6 = vmul.f32 %v584_v58, %v1401_v13 }
 0x2c8   : > { %v683_v17 = vsel %vm407_vm0, %v667_v4, 0.0  ;;  %v682_v20 = vsel %vm407_vm0, %v666_v6, 0.0 }
 0x2c9   : > { %v595_v59 = vpop.permute.xlu1 %594  ;;  %v606_v61 = vpop.permute.xlu0 %605  ;;  %v684_v26 = vadd.f32 %v683_v17, %v682_v20 }
 0x2ca   : > { %v668_v7 = vmul.f32 %v595_v59, %v1408_v18  ;;  %v670_v10 = vmul.f32 %v606_v61, %v1418_v25 }
 0x2cb   : > { %v685_v34 = vrot.slane %v684_v26, 4 }
 0x2cc   : > { %v700_v18 = vsel %vm407_vm0, %v670_v10, 0.0 }
 0x2cd   : > { %v599_v62 = vpop.permute.xlu1 %598  ;;  %v617_v1 = vpop.permute.xlu0 %616  ;;  %v686_v45 = vadd.f32 %v685_v34, %v684_v26 }
 0x2ce   : > { %v669_v2 = vmul.f32 %v599_v62, %v1411_v19  ;;  %v691_v19 = vsel %vm407_vm0, %v668_v7, 0.0  ;;  %v672_v14 = vmul.f32 %v617_v1, %v1442_v44 }
 0x2cf   : > { %v687_v3 = vrot.slane %v686_v45, 2 }
 0x2d0   : > { %v692_v15 = vsel %vm407_vm0, %v669_v2, 0.0 }
 0x2d1   : > { %v610_v11 = vpop.permute.xlu1 %609  ;;  %v628_v12 = vpop.permute.xlu0 %627  ;;  %v693_v21 = vadd.f32 %v692_v15, %v691_v19 }
 0x2d2   : > { %v671_v16 = vmul.f32 %v610_v11, %v1424_v29  ;;  %v709_v29 = vsel %vm407_vm0, %v672_v14, 0.0  ;;  %v674_v27 = vmul.f32 %v628_v12, %v1431_v36  ;;  %v688_v11 = vadd.f32 %v687_v3, %v686_v45 }
 0x2d3   : > { %v694_v30 = vrot.slane %v693_v21, 4 }
 0x2d4   : > { %v701_v13 = vsel %vm407_vm0, %v671_v16, 0.0  ;;  %v718_v38 = vsel %vm407_vm0, %v674_v27, 0.0 }
 0x2d5   : > { %v621_v25 = vpop.permute.xlu1 %620  ;;  %v639_v22 = vpop.permute.xlu0 %638  ;;  %v702_v23 = vadd.f32 %v701_v13, %v700_v18  ;;  %v695_v41 = vadd.f32 %v694_v30, %v693_v21  ;;  %v689_v21 = vrot.slane %v688_v11, 1 }
 0x2d6   : > { %v673_v24 = vmul.f32 %v621_v25, %v1447_v47  ;;  %v676_v47 = vmul.f32 %v639_v22, %v1453_v52 }
 0x2d7   : > { %v703_v32 = vrot.slane %v702_v23, 4  ;;  %v696_v50 = vrot.slane %v695_v41, 2  ;;  %v690_v30 = vadd.f32 %v689_v21, %v688_v11 }
 0x2d8   : > { %v710_v28 = vsel %vm407_vm0, %v673_v24, 0.0 }
 0x2d9   : > { %v711_v31 = vadd.f32 %v710_v28, %v709_v29  ;;  %v632_v44 = vpop.permute.xlu1 %631  ;;  %v650_v37 = vpop.permute.xlu0 %649  ;;  %v704_v43 = vadd.f32 %v703_v32, %v702_v23  ;;  %v697_v1 = vadd.f32 %v696_v50, %v695_v41 }
 0x2da   : > { %v675_v33 = vmul.f32 %v632_v44, %v1436_v39  ;;  %v727_v39 = vsel %vm407_vm0, %v676_v47, 0.0  ;;  %v678_v49 = vmul.f32 %v650_v37, %v1464_v60 }
 0x2db   : > { %v712_v35 = vrot.slane %v711_v31, 4  ;;  %v705_v56 = vrot.slane %v704_v43, 2  ;;  %v698_v19 = vrot.slane %v697_v1, 1 }
 0x2dc   : > { %v719_v40 = vsel %vm407_vm0, %v675_v33, 0.0  ;;  %v736_v61 = vsel %vm407_vm0, %v678_v49, 0.0 }
 0x2dd   : > { %v720_v42 = vadd.f32 %v719_v40, %v718_v38  ;;  %v643_v36 = vpop.permute.xlu1 %642  ;;  %v713_v46 = vadd.f32 %v712_v35, %v711_v31  ;;  %v661_v53 = vpop.permute.xlu0 %660  ;;  %v706_v7 = vadd.f32 %v705_v56, %v704_v43 }
 0x2de   : > { %v677_v0 = vmul.f32 %v643_v36, %v1458_v55  ;;  %v680_v62 = vmul.f32 %v661_v53, %v1475_v5 }
 0x2df   : > { %v721_v48 = vrot.slane %v720_v42, 4  ;;  %v714_v58 = vrot.slane %v713_v46, 2  ;;  %v707_v18 = vrot.slane %v706_v7, 1 }
 0x2e0   : > { %v728_v8 = vsel %vm407_vm0, %v677_v0, 0.0  ;;  %v745_v17 = vsel %vm407_vm0, %v680_v62, 0.0 }
 0x2e1   : > { %v722_v51 = vadd.f32 %v721_v48, %v720_v42  ;;  %v729_v52 = vadd.f32 %v728_v8, %v727_v39  ;;  %v654_v54 = vpop.permute.xlu1 %653  ;;  %v715_v12 = vadd.f32 %v714_v58, %v713_v46  ;;  %v708_v28 = vadd.f32 %v707_v18, %v706_v7 }
 0x2e2   : > { %v679_v57 = vmul.f32 %v654_v54, %v1469_v63 }
 0x2e3   : > { %v730_v55 = vrot.slane %v729_v52, 4  ;;  %v723_v59 = vrot.slane %v722_v51, 2  ;;  %v716_v25 = vrot.slane %v715_v12, 1 }
 0x2e4   : > { %v737_v60 = vsel %vm407_vm0, %v679_v57, 0.0 }
 0x2e5   : > { %v731_v2 = vadd.f32 %v730_v55, %v729_v52  ;;  %v738_v4 = vadd.f32 %v737_v60, %v736_v61  ;;  %v665_v6 = vpop.permute.xlu1 %664  ;;  %v724_v16 = vadd.f32 %v723_v59, %v722_v51  ;;  %v717_v31 = vadd.f32 %v716_v25, %v715_v12 }
 0x2e6   : > { %v681_v10 = vmul.f32 %v665_v6, %v1480_v9  ;;  %v699_v9 = vadd.f32 %v698_v19, %v697_v1 }
 0x2e7   : > { %v732_v63 = vrot.slane %v731_v2, 2  ;;  %v739_v15 = vrot.slane %v738_v4, 4  ;;  %v725_v24 = vrot.slane %v724_v16, 1 }
 0x2e8   : > { %v746_v20 = vsel %vm407_vm0, %v681_v10, 0.0  ;;  %v762_v34 = vsel %vm550_vm2, %v699_v9, %v690_v30 }
 0x2e9   : > { %v733_v5 = vadd.f32 %v732_v63, %v731_v2  ;;  %v740_v14 = vadd.f32 %v739_v15, %v738_v4  ;;  %v747_v13 = vadd.f32 %v746_v20, %v745_v17  ;;  %v726_v33 = vadd.f32 %v725_v24, %v724_v16 }
 0x2ea   : > { %v763_v38 = vsel %vm552_vm3, %v708_v28, %v762_v34 }
 0x2eb   : > { %v741_v22 = vrot.slane %v740_v14, 2  ;;  %v748_v23 = vrot.slane %v747_v13, 4  ;;  %v734_v26 = vrot.slane %v733_v5, 1  ;;  %v764_v40 = vsel %vm554_vm4, %v717_v31, %v763_v38 }
 0x2ec   : > { %v765_v42 = vsel %vm556_vm5, %v726_v33, %v764_v40 }
 0x2ed   : > { %v742_v29 = vadd.f32 %v741_v22, %v740_v14  ;;  %v749_v27 = vadd.f32 %v748_v23, %v747_v13  ;;  %v735_v35 = vadd.f32 %v734_v26, %v733_v5 }
 0x2ef   : > { %v743_v44 = vrot.slane %v742_v29, 1  ;;  %v750_v32 = vrot.slane %v749_v27, 2  ;;  %v766_v36 = vsel %vm558_vm6, %v735_v35, %v765_v42 }
 0x2f1   : > { %v751_v37 = vadd.f32 %v750_v32, %v749_v27  ;;  %v744_v47 = vadd.f32 %v743_v44, %v742_v29 }
 0x2f3   : > { %v752_v41 = vrot.slane %v751_v37, 1  ;;  %v767_v0 = vsel %vm560_vm7, %v744_v47, %v766_v36 }
 0x2f5   : > { %v753_v43 = vadd.f32 %v752_v41, %v751_v37 }
 0x2f7   : > { %v768_v45 = vsel %vm562_vm8, %v753_v43, %v767_v0 }
 0x2f8   : > { %770 = vst.msk [vmem:[%s270_s10] sm:$0xff] %vm407_vm0, %v768_v45 }
 0x2f9   : > { %1129 = shalt.err (!%p1126_p4)
}
 0x2fa   : > { %s1130_s5 = scalar_lea.hbm %s1597_s29, 128  ;;  %s1134_s30 = scalar_lea.hbm %s1646_s3, 256 }
 0x2fb   : > { %p1131_p5 = scmp.ne.s32.totalorder %s1597_s29, %s1130_s5  ;;  %p1135_p3 = scmp.lt.u32.totalorder %s1597_s29, %s1646_s3 }
 0x2fc   : > { %p1136_p10 = scmp.lt.u32.totalorder %s1134_s30, %s1130_s5  ;;  %p1138_p9 = scmp.lt.u32.totalorder %s1130_s5, %s1597_s29 }
 0x2fd   : > { %p1132_p6 = pnand %p1131_p5, %p1659_p7 }
 0x2fe   : > { %p1137_p8 = por %p1136_p10, %p1135_p3 }
 0x2ff   : > { %p1133_p13 = pneg %p1132_p6 }
 0x300   : > { %p1139_p0 = por %p1138_p9, %p1137_p8 }
 0x302   : > { %p1140_p1 = pnand %p1139_p0, %p1133_p13 }
 0x304   : > { %1143 = shalt.err (!%p1140_p1)
}
 0x305   : > { %968 = dma.vmem_to_hbm [thread:$0]  (%p1659_p7), %s1599_s12, 128, %s1597_s29, %s773_s6  }
 0x306 PF: > { %s816_s20 = sand.u32 1, %s1178_s15   ;;  %p1660_p11 = scmp.ne.s32.totalorder %s1653_s28, 0 }
 0x307   : > { %p1661_p12 = scmp.ge.s32.totalorder %s1190_s18, 2  ;;  %s817_s25 = scalar_lea.sflag [#allocation4], %s816_s20 }
 0x309   : > { %p980_p2 = pnand %p1661_p12, %p1660_p11 }
 0x30b   : > { %1169 = dma.done.wait (!%p980_p2), %s817_s25, 128  }
 0x30c   : > { %1171 = vsyncadd (!%p980_p2), %s817_s25, 4294967168  ;;  %s826_s10 = scalar_lea.sflag [#allocation9], %s816_s20 }
 0x30d   : > { %1173 = dma.done.wait (!%p980_p2), %s826_s10, 128  }
 0x30e   : > { %1175 = vsyncadd (!%p980_p2), %s826_s10, 4294967168  ;;  %p24_p7 = scmp.ge.s32.totalorder %s1249_s21, 4   ;;  %s1662_s15 = smov %s1182_s16 }
 0x30f   : > { %s1663_s16 = smov %s1186_s17  ;;  %s1664_s17 = smov %s1261_s24 }
 0x310   : > { %s1665_s18 = smov %s1249_s21  ;;  %26 = sbr.rel (!%p24_p7) target bundleno = 9 (0x9), region = 110 }
 0x317   :  { %831 = vsyncpa [#allocation3], 1 }
 0x318   :  { %833 = vsyncpa [#allocation3 + $0x1], 1 }
 0x319   :  { %834 = vsyncpa [#allocation6], 1 }
 0x31a   :  { %836 = vsyncpa [#allocation6 + $0x1], 1 }
 0x31b   :  { %837 = vsyncpa [#allocation4], 1 }
 0x31c   :  { %839 = vsyncpa [#allocation4 + $0x1], 1 }
 0x31d   :  { %840 = vsyncpa [#allocation9], 1 }
 0x31e   :  { %842 = vsyncpa [#allocation9 + $0x1], 1 }

</bundles_post_ra>
